<compile_context>
chip_gen: v5e
topology: v5e:2x2
jax: 0.10.0
libtpu: 0.0.40
codegen_flags: <defaults>
</compile_context>

<pallas_src>
import math
from functools import partial

import numpy as np
import jax
import jax.numpy as jnp
from jax.experimental import pallas as pl
from jax.experimental.pallas import tpu as pltpu


def _round_up(v, m):
    return ((v + m - 1) // m) * m


def _pick_tile(hw, cin, cout_p, n_outs, x_bytes):
    """Largest spatial tile (multiple of 128, <= 1024) whose double-buffered
    blocks fit a conservative VMEM budget (safe on v7x's 64 MiB physical)."""
    hw_cap = _round_up(hw, 128)
    budget = 20 * 2 ** 20
    for thw in (1024, 512, 256, 128):
        if thw > hw_cap and thw != 128:
            continue
        need = (2 * cin * thw * x_bytes                 # x block, 2-buffered
                + n_outs * 2 * cout_p * thw * 4         # f32 outputs, 2-buffered
                + cout_p * cin * x_bytes                # resident weight
                + (cout_p * 8 + 2 * thw) * 4 * 2)       # rowc + grid-xy
        if need <= budget:
            return thw
    return 128


# ----------------------------------------------------------------------------
# Pallas kernel: one detection level, one (batch, spatial-tile) grid step.
#   x_ref    : (1, cin, tHW)   activations (NCHW, spatial flattened), mm dtype
#   w_ref    : (cout_p, cin)   conv weight (native PyTorch layout), mm dtype
#   rowc_ref : (cout_p, 8)     [bias, anchor*stride, is_x, is_xy, is_wh, 0..]
#   gxy_ref  : (2, tHW)        per-column grid x / grid y (f32)
#   raw_ref  : (1, cout_p, tHW) raw conv output (only when with_raw)
#   dec_ref  : (1, cout_p, tHW) decoded output (sigmoid + box transform)
# ----------------------------------------------------------------------------
def _detect_kernel(x_ref, w_ref, rowc_ref, gxy_ref, *out_refs, stride, with_raw):
    if with_raw:
        raw_ref, dec_ref = out_refs
    else:
        (dec_ref,) = out_refs

    x = x_ref[0]                      # (cin, tHW)   lane-dense on spatial dim
    w = w_ref[...]                    # (cout_p, cin)

    # 1x1 conv == channel matmul on the MXU; f32 accumulation.
    raw = jnp.dot(w, x, preferred_element_type=jnp.float32)       # (cout_p,tHW)

    rowc = rowc_ref[...]              # resident per-row constants
    bias = rowc[:, 0:1]
    anc = rowc[:, 1:2]                # anchor*stride at w/h rows, else 0
    is_gx = rowc[:, 2:3] > 0.5        # row is the box-x channel
    is_xy = rowc[:, 3:4] > 0.5        # row is box-x or box-y
    is_wh = rowc[:, 4:5] > 0.5        # row is box-w or box-h

    raw = raw + bias
    if with_raw:
        raw_ref[0] = raw

    # Inference decode, fused (all row/column broadcasts, select-based).
    s = jax.nn.sigmoid(raw)
    t = s * 2.0
    gval = jnp.where(is_gx, gxy_ref[0:1, :], gxy_ref[1:2, :])      # (cout_p,tHW)
    xy = (t - 0.5 + gval) * stride
    wh = (t * t) * anc
    dec_ref[0] = jnp.where(is_xy, xy, jnp.where(is_wh, wh, s))


# ----------------------------------------------------------------------------
# Per-layer wrapper (layout plumbing + pallas_call).
# ----------------------------------------------------------------------------
def detect_layer(x_nchw, w, b, anchors_l, stride, no, na, *,
                 mm_dtype=None, with_raw=True):
    bs, cin, ny, nx = x_nchw.shape
    cout = na * no
    cout_p = _round_up(cout, 8)
    hw = ny * nx

    mm_dtype = jnp.dtype(mm_dtype) if mm_dtype is not None else x_nchw.dtype
    x_bytes = jnp.dtype(mm_dtype).itemsize
    n_outs = 2 if with_raw else 1
    thw = _pick_tile(hw, cin, cout_p, n_outs, x_bytes)
    n_tiles = -(-hw // thw)

    # Free reshape (NCHW is contiguous in this order); no spatial padding.
    x_hw = x_nchw.reshape(bs, cin, hw)
    if x_hw.dtype != mm_dtype:
        x_hw = x_hw.astype(mm_dtype)        # no-op when caller already feeds bf16
    w_k = jnp.asarray(w)
    if w_k.dtype != mm_dtype:
        w_k = w_k.astype(mm_dtype)
    if cout_p != cout:
        w_k = jnp.pad(w_k, ((0, cout_p - cout), (0, 0)))

    # Per-row (output-channel) constants, c = a*no + o (PyTorch Conv2d order).
    o_idx = np.arange(cout) % no
    a_idx = np.arange(cout) // no
    anchors_np = np.asarray(anchors_l, np.float32)
    anc = np.where(o_idx == 2, anchors_np[a_idx, 0] * stride,
                   np.where(o_idx == 3, anchors_np[a_idx, 1] * stride, 0.0))
    rowc_np = np.zeros((cout_p, 8), np.float32)
    rowc_np[:cout, 1] = anc
    rowc_np[:cout, 2] = (o_idx == 0).astype(np.float32)
    rowc_np[:cout, 3] = (o_idx < 2).astype(np.float32)
    rowc_np[:cout, 4] = ((o_idx == 2) | (o_idx == 3)).astype(np.float32)
    rowc = jnp.asarray(rowc_np).at[:cout, 0].set(jnp.asarray(b, jnp.float32))

    # Per-column grid coordinates (x, y) for each spatial position (host-side).
    gy, gx = np.meshgrid(np.arange(ny, dtype=np.float32),
                         np.arange(nx, dtype=np.float32), indexing="ij")
    gxy = jnp.asarray(np.stack([gx.reshape(-1), gy.reshape(-1)], axis=0))

    out_shapes, out_specs = [], []
    if with_raw:
        out_shapes.append(jax.ShapeDtypeStruct((bs, cout_p, hw), jnp.float32))
        out_specs.append(pl.BlockSpec((1, cout_p, thw), lambda bi, j: (bi, 0, j)))
    out_shapes.append(jax.ShapeDtypeStruct((bs, cout_p, hw), jnp.float32))
    out_specs.append(pl.BlockSpec((1, cout_p, thw), lambda bi, j: (bi, 0, j)))

    vmem_need = (2 * cin * thw * x_bytes
                 + n_outs * 2 * cout_p * thw * 4
                 + cout_p * cin * x_bytes
                 + (cout_p * 8 + 2 * thw) * 4 * 2)
    vmem_limit = int(min(64 * 2 ** 20, max(32 * 2 ** 20, 2 * vmem_need)))

    kernel = partial(_detect_kernel, stride=float(stride), with_raw=with_raw)
    outs = pl.pallas_call(
        kernel,
        out_shape=tuple(out_shapes),
        grid_spec=pltpu.PrefetchScalarGridSpec(
            num_scalar_prefetch=0,
            grid=(bs, n_tiles),
            in_specs=[
                pl.BlockSpec((1, cin, thw), lambda bi, j: (bi, 0, j)),   # x
                pl.BlockSpec((cout_p, cin), lambda bi, j: (0, 0)),       # W
                pl.BlockSpec((cout_p, 8), lambda bi, j: (0, 0)),         # rowc
                pl.BlockSpec((2, thw), lambda bi, j: (0, j)),            # grid xy
            ],
            out_specs=tuple(out_specs),
        ),
        compiler_params=pltpu.CompilerParams(
            dimension_semantics=("parallel", "parallel"),
            vmem_limit_bytes=vmem_limit),
    )(x_hw, w_k, rowc, gxy)

    if with_raw:
        raw, dec = outs
    else:
        (dec,) = outs

    if cout_p != cout:
        dec = dec[:, :cout, :]
    # Module return contract (XLA-side layout plumbing):
    #   dec -> z[i]  (bs, na*ny*nx, no);  raw -> x[i]  (bs, na, ny, nx, no)
    z = dec.reshape(bs, na, no, hw).transpose(0, 1, 3, 2).reshape(bs, na * hw, no)
    if with_raw:
        if cout_p != cout:
            raw = raw[:, :cout, :]
        raw5 = raw.reshape(bs, na, no, ny, nx).transpose(0, 1, 3, 4, 2)
        return raw5, z
    return None, z


# ----------------------------------------------------------------------------
# Deterministic parameter init (mirrors nn.Conv2d + YOLOv7Detect.init_weight).
# ----------------------------------------------------------------------------
def init_params(key, in_channels, num_classes, na, stride):
    no = num_classes + 5
    cout = na * no
    params = []
    for li, cin in enumerate(in_channels):
        key, k1, k2 = jax.random.split(key, 3)
        bound = 1.0 / math.sqrt(cin)
        w = jax.random.uniform(k1, (cout, cin), jnp.float32, -bound, bound)
        b = jax.random.uniform(k2, (cout,), jnp.float32, -bound, bound)
        b = b.reshape(na, no)
        b = b.at[:, 4].add(math.log(8.0 / (640.0 / stride[li]) ** 2))
        b = b.at[:, 5:].add(math.log(0.6 / (num_classes - 0.99)))
        b = b.reshape(cout)
        params.append(dict(w=w, b=b))
    return params


# ----------------------------------------------------------------------------
# Pure-JAX reference of the PyTorch forward (correctness check).  mm_dtype
# applies the same documented input-cast as the kernel path under test.
# ----------------------------------------------------------------------------
def ref_layer(x, p, anchors_l, stride, no, na, *, mm_dtype=jnp.float32):
    bs, cin, ny, nx = x.shape
    out = jnp.einsum("bchw,dc->bdhw", x.astype(mm_dtype), p["w"].astype(mm_dtype),
                     preferred_element_type=jnp.float32,
                     precision=jax.lax.Precision.HIGHEST)
    out = out + p["b"].reshape(1, -1, 1, 1)
    x5 = out.reshape(bs, na, no, ny, nx).transpose(0, 1, 3, 4, 2)
    y = jax.nn.sigmoid(x5)
    yv, xv = jnp.meshgrid(jnp.arange(ny), jnp.arange(nx), indexing="ij")
    grid = jnp.stack([xv, yv], -1).reshape(1, 1, ny, nx, 2).astype(jnp.float32)
    anchor_grid = (jnp.asarray(anchors_l, jnp.float32) * stride).reshape(1, na, 1, 1, 2)
    xy = (y[..., 0:2] * 2.0 - 0.5 + grid) * stride
    wh = (y[..., 2:4] * 2.0) ** 2 * anchor_grid
    y = jnp.concatenate([xy, wh, y[..., 4:]], axis=-1)
    return x5, y.reshape(bs, -1, no)


if __name__ == "__main__":
    num_classes = 3
    anchors = ((12, 16, 19, 36, 40, 28),
               (36, 75, 76, 55, 72, 146),
               (142, 110, 192, 243, 459, 401))
    in_channels = [8, 16, 32]
    stride = [8.0, 16.0, 32.0]
    nl = len(anchors)
    na = len(anchors[0]) // 2
    no = num_classes + 5

    key = jax.random.PRNGKey(0)
    key, kp = jax.random.split(key)
    params = init_params(kp, in_channels, num_classes, na, stride)
    anchors_arr = np.asarray(anchors, np.float32).reshape(nl, na, 2)

    # Small deterministic inputs: 64x64 image -> feature maps 8x8, 4x4, 2x2.
    bs, img = 2, 64
    xs = []
    for li, cin in enumerate(in_channels):
        key, kx = jax.random.split(key)
        h = int(img // stride[li])
        xs.append(jax.random.normal(kx, (bs, cin, h, h), jnp.float32))

    # Exercise both the exact-f32 path and the recommended bf16-input path;
    # each is checked against a reference applying the same input dtype.
    for mm_dtype in (jnp.float32, jnp.bfloat16):
        raws, z_parts, zr_parts = [], [], []
        for li in range(nl):
            p = params[li]
            x_in = xs[li].astype(mm_dtype)   # in production the backbone feeds bf16
            raw5, z = detect_layer(x_in, p["w"], p["b"], anchors_arr[li],
                                   stride[li], no, na, with_raw=True)
            raws.append(raw5)
            z_parts.append(z)

            x5_ref, z_ref = ref_layer(xs[li], p, anchors_arr[li], stride[li],
                                      no, na, mm_dtype=mm_dtype)
            np.testing.assert_allclose(np.asarray(raw5), np.asarray(x5_ref),
                                       rtol=1e-2, atol=1e-2)
            zr_parts.append(z_ref)

            # Also exercise the write-traffic-saving path (raw output gated off).
            if li == 0 and mm_dtype == jnp.bfloat16:
                _, z_nr = detect_layer(x_in, p["w"], p["b"], anchors_arr[li],
                                       stride[li], no, na, with_raw=False)
                np.testing.assert_allclose(np.asarray(z_nr), np.asarray(z),
                                           rtol=1e-6, atol=1e-6)

        z_all = jnp.concatenate(z_parts, axis=1)
        jax.block_until_ready(z_all)
        jax.block_until_ready(raws)

        z_ref_all = jnp.concatenate(zr_parts, axis=1)
        np.testing.assert_allclose(np.asarray(z_all), np.asarray(z_ref_all),
                                   rtol=1e-2, atol=1e-2)

    print("KERNEL_OK")
</pallas_src>

<mosaic_0001>
module attributes {stable_mosaic.version = 11 : i64} {
  func.func @_detect_kernel(%arg0: i32, %arg1: i32, %arg2: memref<1x8x128xf32, #tpu.memory_space<vmem>>, %arg3: memref<24x8xf32, #tpu.memory_space<vmem>>, %arg4: memref<24x8xf32, #tpu.memory_space<vmem>>, %arg5: memref<2x128xf32, #tpu.memory_space<vmem>>, %arg6: memref<1x24x128xf32, #tpu.memory_space<vmem>>, %arg7: memref<1x24x128xf32, #tpu.memory_space<vmem>>) attributes {dimension_semantics = [#tpu.dimension_semantics<parallel>, #tpu.dimension_semantics<parallel>], iteration_bounds = array<i64: 2, 1>, scalar_prefetch = 0 : i64, scratch_operands = 0 : i64, tpu.core_type = #tpu.core_type<tc>, window_params = [{transform_indices = @transform_0, window_bounds = array<i64: 1, 8, 128>}, {pipeline_mode = #tpu.pipeline_mode<synchronous>, transform_indices = @transform_1, window_bounds = array<i64: 24, 8>}, {pipeline_mode = #tpu.pipeline_mode<synchronous>, transform_indices = @transform_2, window_bounds = array<i64: 24, 8>}, {transform_indices = @transform_3, window_bounds = array<i64: 2, 128>}, {transform_indices = @transform_4, window_bounds = array<i64: 1, 24, 128>}, {transform_indices = @transform_5, window_bounds = array<i64: 1, 24, 128>}]} {
    %c0 = arith.constant 0 : index
    %c0_0 = arith.constant 0 : index
    %c0_1 = arith.constant 0 : index
    %0 = vector.load %arg2[%c0, %c0_0, %c0_1] : memref<1x8x128xf32, #tpu.memory_space<vmem>>, vector<1x8x128xf32>
    %1 = vector.shape_cast %0 : vector<1x8x128xf32> to vector<8x128xf32>
    %c0_2 = arith.constant 0 : index
    %c0_3 = arith.constant 0 : index
    %2 = vector.load %arg3[%c0_2, %c0_3] : memref<24x8xf32, #tpu.memory_space<vmem>>, vector<24x8xf32>
    %cst = arith.constant dense<0.000000e+00> : vector<24x128xf32>
    %3 = tpu.matmul %2, %1, %cst {dimension_numbers = #tpu.dot_dimension_numbers<[1], [0], [0], [1], [0, 0, 1, 1], [], []>} : vector<24x8xf32>, vector<8x128xf32>, vector<24x128xf32> -> vector<24x128xf32>
    %c0_4 = arith.constant 0 : index
    %c0_5 = arith.constant 0 : index
    %4 = vector.load %arg4[%c0_4, %c0_5] : memref<24x8xf32, #tpu.memory_space<vmem>>, vector<24x8xf32>
    %5 = vector.extract_strided_slice %4 {offsets = [0, 0], sizes = [24, 1], strides = [1, 1]} : vector<24x8xf32> to vector<24x1xf32>
    %6 = vector.extract_strided_slice %4 {offsets = [0, 1], sizes = [24, 1], strides = [1, 1]} : vector<24x8xf32> to vector<24x1xf32>
    %7 = vector.extract_strided_slice %4 {offsets = [0, 2], sizes = [24, 1], strides = [1, 1]} : vector<24x8xf32> to vector<24x1xf32>
    %cst_6 = arith.constant 5.000000e-01 : f32
    %8 = vector.broadcast %cst_6 : f32 to vector<24x1xf32>
    %9 = arith.cmpf ogt, %7, %8 : vector<24x1xf32>
    %10 = vector.extract_strided_slice %4 {offsets = [0, 3], sizes = [24, 1], strides = [1, 1]} : vector<24x8xf32> to vector<24x1xf32>
    %cst_7 = arith.constant 5.000000e-01 : f32
    %11 = vector.broadcast %cst_7 : f32 to vector<24x1xf32>
    %12 = arith.cmpf ogt, %10, %11 : vector<24x1xf32>
    %13 = vector.extract_strided_slice %4 {offsets = [0, 4], sizes = [24, 1], strides = [1, 1]} : vector<24x8xf32> to vector<24x1xf32>
    %cst_8 = arith.constant 5.000000e-01 : f32
    %14 = vector.broadcast %cst_8 : f32 to vector<24x1xf32>
    %15 = arith.cmpf ogt, %13, %14 : vector<24x1xf32>
    %16 = vector.broadcast %5 : vector<24x1xf32> to vector<24x128xf32>
    %17 = arith.addf %3, %16 : vector<24x128xf32>
    %c0_9 = arith.constant 0 : index
    %c0_10 = arith.constant 0 : index
    %c0_11 = arith.constant 0 : index
    %18 = vector.load %arg6[%c0_9, %c0_10, %c0_11] : memref<1x24x128xf32, #tpu.memory_space<vmem>>, vector<1x24x128xf32>
    %19 = vector.shape_cast %18 : vector<1x24x128xf32> to vector<24x128xf32>
    %20 = vector.shape_cast %17 : vector<24x128xf32> to vector<1x24x128xf32>
    tpu.vector_store %arg6[%c0_9, %c0_10, %c0_11], %20 {strides = array<i32>} : memref<1x24x128xf32, #tpu.memory_space<vmem>>, vector<1x24x128xf32>,
    %21 = arith.negf %17 : vector<24x128xf32>
    %22 = math.exp %21 : vector<24x128xf32>
    %cst_12 = arith.constant 1.000000e+00 : f32
    %23 = vector.broadcast %cst_12 : f32 to vector<24x128xf32>
    %24 = arith.addf %23, %22 : vector<24x128xf32>
    %25 = arith.divf %23, %24 : vector<24x128xf32>
    %cst_13 = arith.constant 2.000000e+00 : f32
    %26 = vector.broadcast %cst_13 : f32 to vector<24x128xf32>
    %27 = arith.mulf %25, %26 : vector<24x128xf32>
    %c0_14 = arith.constant 0 : index
    %c0_15 = arith.constant 0 : index
    %28 = vector.load %arg5[%c0_14, %c0_15] : memref<2x128xf32, #tpu.memory_space<vmem>>, vector<1x128xf32>
    %c1 = arith.constant 1 : index
    %c0_16 = arith.constant 0 : index
    %29 = vector.load %arg5[%c1, %c0_16] : memref<2x128xf32, #tpu.memory_space<vmem>>, vector<1x128xf32>
    %30 = vector.shape_cast %9 : vector<24x1xi1> to vector<24x1xi1>
    %31 = vector.broadcast %30 : vector<24x1xi1> to vector<24x128xi1>
    %32 = vector.shape_cast %28 : vector<1x128xf32> to vector<1x128xf32>
    %33 = vector.broadcast %32 : vector<1x128xf32> to vector<24x128xf32>
    %34 = vector.shape_cast %29 : vector<1x128xf32> to vector<1x128xf32>
    %35 = vector.broadcast %34 : vector<1x128xf32> to vector<24x128xf32>
    %36 = arith.select %31, %33, %35 : vector<24x128xi1>, vector<24x128xf32>
    %cst_17 = arith.constant 5.000000e-01 : f32
    %37 = vector.broadcast %cst_17 : f32 to vector<24x128xf32>
    %38 = arith.subf %27, %37 : vector<24x128xf32>
    %39 = arith.addf %38, %36 : vector<24x128xf32>
    %cst_18 = arith.constant 8.000000e+00 : f32
    %40 = vector.broadcast %cst_18 : f32 to vector<24x128xf32>
    %41 = arith.mulf %39, %40 : vector<24x128xf32>
    %42 = arith.mulf %27, %27 : vector<24x128xf32>
    %43 = vector.broadcast %6 : vector<24x1xf32> to vector<24x128xf32>
    %44 = arith.mulf %42, %43 : vector<24x128xf32>
    %45 = vector.shape_cast %15 : vector<24x1xi1> to vector<24x1xi1>
    %46 = vector.broadcast %45 : vector<24x1xi1> to vector<24x128xi1>
    %47 = arith.select %46, %44, %25 : vector<24x128xi1>, vector<24x128xf32>
    %48 = vector.shape_cast %12 : vector<24x1xi1> to vector<24x1xi1>
    %49 = vector.broadcast %48 : vector<24x1xi1> to vector<24x128xi1>
    %50 = arith.select %49, %41, %47 : vector<24x128xi1>, vector<24x128xf32>
    %c0_19 = arith.constant 0 : index
    %c0_20 = arith.constant 0 : index
    %c0_21 = arith.constant 0 : index
    %51 = vector.load %arg7[%c0_19, %c0_20, %c0_21] : memref<1x24x128xf32, #tpu.memory_space<vmem>>, vector<1x24x128xf32>
    %52 = vector.shape_cast %51 : vector<1x24x128xf32> to vector<24x128xf32>
    %53 = vector.shape_cast %50 : vector<24x128xf32> to vector<1x24x128xf32>
    tpu.vector_store %arg7[%c0_19, %c0_20, %c0_21], %53 {strides = array<i32>} : memref<1x24x128xf32, #tpu.memory_space<vmem>>, vector<1x24x128xf32>,
    return
  }
  func.func @transform_0(%arg0: i32, %arg1: i32) -> (i32, i32, i32) {
    %c0_i32 = arith.constant 0 : i32
    %c0_i32_0 = arith.constant 0 : i32
    return %arg0, %c0_i32, %arg1 : i32, i32, i32
  }
  func.func @transform_1(%arg0: i32, %arg1: i32) -> (i32, i32) {
    %c0_i32 = arith.constant 0 : i32
    %c0_i32_0 = arith.constant 0 : i32
    %c0_i32_1 = arith.constant 0 : i32
    return %c0_i32, %c0_i32_0 : i32, i32
  }
  func.func @transform_2(%arg0: i32, %arg1: i32) -> (i32, i32) {
    %c0_i32 = arith.constant 0 : i32
    %c0_i32_0 = arith.constant 0 : i32
    %c0_i32_1 = arith.constant 0 : i32
    return %c0_i32, %c0_i32_0 : i32, i32
  }
  func.func @transform_3(%arg0: i32, %arg1: i32) -> (i32, i32) {
    %c0_i32 = arith.constant 0 : i32
    %c0_i32_0 = arith.constant 0 : i32
    return %c0_i32, %arg1 : i32, i32
  }
  func.func @transform_4(%arg0: i32, %arg1: i32) -> (i32, i32, i32) {
    %c0_i32 = arith.constant 0 : i32
    %c0_i32_0 = arith.constant 0 : i32
    return %arg0, %c0_i32, %arg1 : i32, i32, i32
  }
  func.func @transform_5(%arg0: i32, %arg1: i32) -> (i32, i32, i32) {
    %c0_i32 = arith.constant 0 : i32
    %c0_i32_0 = arith.constant 0 : i32
    return %arg0, %c0_i32, %arg1 : i32, i32, i32
  }
}

</mosaic_0001>

<bundles_post_ra>
// kernel: tpu_custom_call.1
= control target key start
LH: loop header
LB: loop body
LE: loop exit
PB: predicated region body
PF: predicated region fallthrough
CT: control target
= control target key end

     0   :  { %11 = vsyncpa [#allocation3], 0  ;;  %s1108_s0 = inlined_call_operand.vmem [shape: f32[2,8,64], index: 0, kind: input, shape index: {}]   ;;  %s1109_s1 = inlined_call_operand.vmem [shape: f32[24,8], index: 1, kind: input, shape index: {}]   ;;  %s1110_s2 = inlined_call_operand.vmem [shape: f32[24,8], index: 2, kind: input, shape index: {}]   ;;  %s1111_s3 = inlined_call_operand.vmem [shape: f32[2,64], index: 3, kind: input, shape index: {}]   ;;  %s1112_s4 = inlined_call_operand.hbm [shape: f32[2,24,64], index: 4, kind: output, shape index: {0}]   ;;  %s1113_s5 = inlined_call_operand.hbm [shape: f32[2,24,64], index: 5, kind: output, shape index: {1}]  }
   0x1   :  { %13 = vsyncpa [#allocation3 + $0x1], 0 }
   0x2   :  { %14 = vsyncpa [#allocation5], 0 }
   0x3   :  { %16 = vsyncpa [#allocation5 + $0x1], 0  ;;  %s914_s18 = smov 0   ;;  %s916_s19 = smov 0  }
   0x4   :  { %s918_s20 = smov 0   ;;  %s920_s21 = smov 0  }
   0x5   :  { %s922_s22 = smov 0   ;;  %s924_s23 = smov 0  }
   0x6 LB: > { %s646_s24 = sadd.s32 4294967295, %s875_s23   ;;  %s647_s25 = sadd.s32 4294967294, %s875_s23   ;;  %s875_s23 = sphi %s924_s23, %s22_s23   ;;  %s871_s22 = sphi %s922_s22, %s1120_s22   ;;  %s867_s21 = sphi %s920_s21, %s1119_s21   ;;  %s863_s20 = sphi %s918_s20, %s1118_s20   ;;  %s859_s19 = sphi %s916_s19, %s1117_s19   ;;  %s855_s18 = sphi %s914_s18, %s1116_s18  }
   0x7   : > { %s34_s26 = sadd.s32 1, %s871_s22  ;;  %s139_s27 = sadd.s32 1, %s863_s20 }
   0x8   : > { %p36_p0 = scmp.ge.s32.totalorder %s34_s26, 2  ;;  %p149_p1 = scmp.ne.s32.totalorder %s863_s20, %s859_s19 }
   0x9   : > { %p150_p2 = scmp.eq.s32.totalorder %s646_s24, 1  ;;  %p155_p3 = scmp.ne.s32.totalorder %s859_s19, %s855_s18 }
   0xa   : > { %s1122_s26 = smov (%p36_p0, %s34_s26), 0  ;;  %p156_p5 = scmp.eq.s32.totalorder %s647_s25, 1 }
   0xb   : > { %p954_p4 = por %p150_p2, %p149_p1  ;;  %s134_s29 = ssub.s32 %s871_s22, %s1122_s26 }
   0xc   : > { %p651_p6 = scmp.ge.s32.totalorder %s875_s23, 1  ;;  %p137_p7 = scmp.eq.s32.totalorder %s134_s29, 0 }
   0xd   : > { %p961_p8 = por %p156_p5, %p155_p3  ;;  %p225_p9 = scmp.lt.s32.totalorder %s875_s23, 3 }
   0xe   : > { %s967_s6 = scalar_select %p137_p7, %s863_s20, %s139_s27  }
   0xf   : > { %p226_p10 = pnand %p651_p6, %p225_p9 }
  0x10   : > { %p264_p11 = scmp.lt.s32.totalorder (!%p226_p10), %s867_s21, 1  ;;  %s993_s9 = sand.u32 (!%p226_p10), 1, %s859_s19  }
  0x11   : > { %229 = sbr.rel (%p226_p10) target bundleno = 204 (0xcc), region = 36  ;;  %s482_s24 = scalar_lea.sflag (!%p226_p10), [#allocation3], %s993_s9 }
  0x12   : > { %s668_s10 = smul.u32 (!%p226_p10), 24, %s993_s9  ;;  %s785_s8 = scalar_lea.hbm (!%p226_p10), %s1112_s4, 48 }
  0x13   : > { %s669_s11 = smul.u32 (!%p226_p10), 24, %s867_s21 }
  0x14   : > { %s256_s15 = scalar_lea.vmem (!%p226_p10), [#allocation2], %s668_s10 }
  0x15   : > { %s500_s16 = sshll.u32 (!%p226_p10), %s256_s15, 4  ;;  %s501_s16 = int_to_ptr.vmem [resolvable:$true] %s500_s16 }
  0x16   : > { %v877_v0 = vmov 0   ;;  %v279_v1 = vld [vmem:[%s1110_s2] sm:$0xff]  ;;  %v281_v2 = vld [vmem:[%s1110_s2 + $0x10] sm:$0xff]  ;;  %v280_v3 = vld [vmem:[%s1110_s2 + $0x8] sm:$0xff]  ;;  %s265_s13 = scalar_select %p264_p11, %s867_s21, 1  ;;  %v878_v4 = vmov 2  }
  0x17   : > { %738 = vset.pattern.permute.xlu0 %v877_v0  ;;  %739 = vset.pattern.permute.xlu1 %v877_v0  ;;  %vm283_vm0 = vcmp.gt.f32.partialorder %v280_v3, 0.5  ;;  %v276_v6 = vld [vmem:[%s1109_s1] sm:$0xff]  ;;  %vm300_vm1 = vcmask 64512   ;;  %vm282_vm2 = vcmp.gt.f32.partialorder %v279_v1, 0.5  ;;  %v277_v8 = vld [vmem:[%s1109_s1 + $0x8] sm:$0xff]  ;;  %v278_v9 = vld [vmem:[%s1109_s1 + $0x10] sm:$0xff] }
  0x18   : > { %287 = vperm.xlu0 %738, %v279_v1   ;;  %297 = vperm.xlu1 %739, %v281_v2   ;;  %v402_v5 = vsel %vm283_vm0, 1, %v877_v0  ;;  %s652_s14 = sshll.u32 %s265_s13, 3  ;;  %vm284_vm3 = vcmp.gt.f32.partialorder %v281_v2, 0.5  ;;  %v401_v10 = vsel %vm282_vm2, 1, %v877_v0  ;;  %v879_v12 = vmov 1  }
  0x19   : > { %741 = vset.pattern.permute.xlu2 %v878_v4  ;;  %s270_s17 = scalar_lea.vmem %s1108_s0, %s652_s14  ;;  %v403_v11 = vsel %vm284_vm3, 1, %v877_v0  ;;  %v880_v13 = vmov 4   ;;  %v881_v14 = vmov 3   ;;  %s499_s14 = scalar_lea.hbm %s1112_s4, %s669_s11 }
  0x1a   : > { %408 = vperm.xlu2 %741, %v402_v5   ;;  %v275_v7 = vld [vmem:[%s270_s17] sm:$0xff]  ;;  %s502_s17 = sshll.u32 %s499_s14, 4  ;;  %s503_s17 = int_to_ptr.hbm [resolvable:$true] %s502_s17 }
  0x1b   : > { %325 = vmatpush.msra.mxu0 %v275_v7  ;;  %666 = vmatpush.msra.mxu1 %v275_v7  ;;  %s779_s25 = sshra.s32 %s503_s17, 4  ;;  %s780_s25 = int_to_ptr.hbm [resolvable:$true] %s779_s25 }
  0x1c   : > { %667 = vmatpush.msra.mxu2 %v275_v7  ;;  %653 = vmatmul.msk.f32.vlgmr.msra.gmra.mxu0 %vm300_vm1, %v276_v6  ;;  %s781_s27 = scalar_lea.hbm %s780_s25, 24  ;;  %p786_p1 = scmp.lt.s32.totalorder %s780_s25, %s1112_s4 }
  0x1d   : > { %654 = vmatmul.msk.f32.vlgmr.msra.gmra.mxu1 %vm300_vm1, %v277_v8  ;;  %655 = vmatmul.msk.f32.vlgmr.msra.gmra.mxu2 %vm300_vm1, %v278_v9  ;;  %p782_p12 = scmp.ne.s32.totalorder %s780_s25, %s781_s27  ;;  %p787_p2 = scmp.lt.s32.totalorder %s785_s8, %s781_s27 }
  0x1f   : > { %p783_p13 = pnand %p782_p12, %p954_p4  ;;  %p788_p3 = por %p787_p2, %p786_p1 }
  0x20   : > { %292 = vperm.xlu0 %738, %v280_v3   ;;  %740 = vset.pattern.permute.xlu1 %v878_v4 }
  0x21   : > { %405 = vperm.xlu1 %740, %v401_v10   ;;  %p784_p0 = pneg %p783_p13 }
  0x22   : > { %411 = vperm.xlu2 %741, %v403_v11  }
  0x23   : > { %p789_p5 = pnand %p788_p3, %p784_p0 }
  0x28   : > { %742 = vset.pattern.permute.xlu0 %v879_v12 }
  0x29   : > { %743 = vset.pattern.permute.xlu1 %v879_v12  ;;  %434 = vperm.xlu0 %742, %v279_v1  }
  0x2a   : > { %438 = vperm.xlu1 %743, %v280_v3   ;;  %744 = vset.pattern.permute.xlu2 %v879_v12 }
  0x2b   : > { %442 = vperm.xlu2 %744, %v281_v2  }
  0x31   : > { %747 = vset.pattern.permute.xlu0 %v880_v13 }
  0x32   : > { %745 = vset.pattern.permute.xlu1 %v880_v13  ;;  %455 = vperm.xlu0 %747, %v403_v11  }
  0x33   : > { %449 = vperm.xlu1 %745, %v401_v10   ;;  %746 = vset.pattern.permute.xlu2 %v880_v13 }
  0x34   : > { %452 = vperm.xlu2 %746, %v402_v5  }
  0x3a   : > { %750 = vset.pattern.permute.xlu0 %v881_v14 }
  0x3b   : > { %748 = vset.pattern.permute.xlu1 %v881_v14 }
  0x3c   : > { %464 = vperm.xlu1 %748, %v401_v10   ;;  %749 = vset.pattern.permute.xlu2 %v881_v14 }
  0x3d   : > { %467 = vperm.xlu2 %749, %v402_v5  }
  0x44   : > { %470 = vperm.xlu1 %748, %v403_v11  }
  0x74   : > { %v995_v17 = vpop.permute.xlu2 %408 }
  0x7c   : > { %v1008_v26 = vpop.permute.xlu2 %411 }
  0x8a   : > { %v288_v15 = vpop.permute.xlu0 %287  ;;  %v298_v16 = vpop.permute.xlu1 %297 }
  0x92   : > { %v293_v19 = vpop.permute.xlu0 %292 }
  0x93   : > { %v999_v23 = vpop.permute.xlu1 %405 }
  0x99   : > { %v327_v18 = vpop.f32.mrf.mxu0 }
  0x9a   : > { %v328_v20 = vadd.f32 %v327_v18, %v288_v15  ;;  %v330_v21 = vpop.f32.mrf.mxu1 }
  0x9b   : > { %v331_v22 = vadd.f32 %v330_v21, %v293_v19 }
  0x9c   : > { %336 = vst [vmem:[%s256_s15] sm:$0xff] %v328_v20  ;;  %v656_v24 = vmul.f32 -1.442695, %v328_v20 }
  0x9d   : > { %337 = vst [vmem:[%s256_s15 + $0x8] sm:$0xff] %v331_v22  ;;  %v657_v25 = vmul.f32 -1.442695, %v331_v22 }
  0x9e   : > { %753 = vpow2.f32 %v656_v24 }
  0x9f   : > { %755 = vpow2.f32 %v657_v25 }
  0xa0   : > { %v333_v27 = vpop.f32.mrf.mxu2 }
  0xa1   : > { %v334_v28 = vadd.f32 %v333_v27, %v298_v16 }
  0xa3   : > { %338 = vst [vmem:[%s256_s15 + $0x10] sm:$0xff] %v334_v28  ;;  %v658_v29 = vmul.f32 -1.442695, %v334_v28 }
  0xa4   : > { %v754_v30 = vpop.eup %753 }
  0xa5   : > { %792 = shalt.err (!%p789_p5)
}
  0xa6   : > { %s882_s14 = smov 128   ;;  %s883_s15 = smov 8   ;;  %v756_v31 = vpop.eup %755  ;;  %v348_v32 = vadd.f32 1.0, %v754_v30  ;;  %757 = vpow2.f32 %v658_v29  ;;  %v1024_v33 = vpop.permute.xlu1 %438  ;;  %v1036_v43 = vld [vmem:[%s1111_s3] ss:$0 sm:$0xff]  ;;  %vm414_vm4 = vcmp.eq.s32.totalorder %v995_v17, 1 }
  0xa7   : > { %671 = dma.vmem_to_hbm [thread:$0]  (%p954_p4), %s501_s16, 384, %s503_s17, %s482_s24, %s882_s14, %s882_s14, %s883_s15   ;;  %v349_v34 = vadd.f32 1.0, %v756_v31  ;;  %v1026_v35 = vpop.permute.xlu2 %442  ;;  %v435_v60 = vpop.permute.xlu0 %434  ;;  %vm413_vm11 = vcmp.eq.s32.totalorder %v999_v23, 1  ;;  %vm415_vm14 = vcmp.eq.s32.totalorder %v1008_v26, 1 }
  0xa8   : > { %759 = vrcp.f32 %v348_v32  ;;  %v1041_v44 = vld [vmem:[%s1111_s3 + $0x1] ss:$0 sm:$0xff]  ;;  %v362_v46 = vand.u32 2147483648, %v348_v32  ;;  %v360_v50 = vand.u32 2147483647, %v348_v32  ;;  %vm356_vm7 = vweird.f32 %v348_v32  ;;  %s517_s7 = scalar_lea.hbm %s1113_s5, %s669_s11  ;;  %s263_s8 = scalar_lea.vmem [#allocation4], %s668_s10 }
  0xa9   : > { %761 = vrcp.f32 %v349_v34  ;;  %v377_v51 = vand.u32 2147483648, %v349_v34  ;;  %v375_v53 = vand.u32 2147483647, %v349_v34  ;;  %v419_v55 = vsel %vm414_vm4, %v1036_v43, %v1041_v44  ;;  %s518_s21 = sshll.u32 %s263_s8, 4  ;;  %s520_s11 = sshll.u32 %s517_s7, 4  ;;  %s519_s21 = int_to_ptr.vmem [resolvable:$true] %s518_s21  ;;  %s521_s11 = int_to_ptr.hbm [resolvable:$true] %s520_s11 }
  0xaa   : > { %v363_v57 = vor.u32 1.1754944e-38, %v362_v46  ;;  %vm371_vm9 = vweird.f32 %v349_v34  ;;  %vm361_vm10 = vcmp.eq.f32.partialorder %v360_v50, 8.507059e+37  ;;  %v418_v9 = vsel %vm413_vm11, %v1036_v43, %v1041_v44  ;;  %s487_s10 = scalar_lea.sflag [#allocation5], %s993_s9  ;;  %s807_s12 = sshra.s32 %s521_s11, 4  ;;  %s808_s12 = int_to_ptr.hbm [resolvable:$true] %s807_s12 }
  0xab   : > { %v378_v62 = vor.u32 1.1754944e-38, %v377_v51  ;;  %vm376_vm13 = vcmp.eq.f32.partialorder %v375_v53, 8.507059e+37  ;;  %s809_s13 = scalar_lea.hbm %s808_s12, 24  ;;  %s813_s24 = scalar_lea.hbm %s1113_s5, 48 }
  0xac   : > { %v758_v36 = vpop.eup %757  ;;  %p810_p6 = scmp.ne.s32.totalorder %s808_s12, %s809_s13  ;;  %p814_p10 = scmp.lt.s32.totalorder %s808_s12, %s1113_s5 }
  0xad   : > { %v1028_v37 = vadd.f32 1.0, %v758_v36  ;;  %p815_p11 = scmp.lt.s32.totalorder %s813_s24, %s809_s13 }
  0xae   : > { %v760_v38 = vpop.eup %759  ;;  %v1031_v42 = vpop.permute.xlu1 %449  ;;  %p811_p7 = pnand %p810_p6, %p954_p4 }
  0xaf   : > { %v762_v39 = vpop.eup %761  ;;  %v352_v40 = vmul.f32 %v760_v38, %v348_v32  ;;  %763 = vrcp.f32 %v1028_v37  ;;  %v453_v48 = vpop.permute.xlu2 %452  ;;  %vm357_vm5 = vweird.f32 %v760_v38  ;;  %v392_v3 = vand.u32 2147483648, %v1028_v37  ;;  %p816_p12 = por %p815_p11, %p814_p10 }
  0xb0   : > { %v367_v41 = vmul.f32 %v762_v39, %v349_v34  ;;  %vm372_vm6 = vweird.f32 %v762_v39  ;;  %vm358_vm8 = vmor %vm356_vm7, %vm357_vm5  ;;  %v390_v6 = vand.u32 2147483647, %v1028_v37  ;;  %vm458_vm0 = vcmp.eq.s32.totalorder %v453_v48, 1  ;;  %v456_v29 = vpop.permute.xlu0 %455  ;;  %p812_p9 = pneg %p811_p7 }
  0xb1   : > { %v353_v45 = vsub.f32 1.0, %v352_v40  ;;  %vm373_vm12 = vmor %vm371_vm9, %vm372_vm6  ;;  %vm386_vm1 = vweird.f32 %v1028_v37  ;;  %v393_v17 = vor.u32 1.1754944e-38, %v392_v3  ;;  %vm457_vm3 = vcmp.eq.s32.totalorder %v1031_v42, 1 }
  0xb2   : > { %v368_v47 = vsub.f32 1.0, %v367_v41  ;;  %vm391_vm4 = vcmp.eq.f32.partialorder %v390_v6, 8.507059e+37  ;;  %v420_v34 = vsel %vm415_vm14, %v1036_v43, %v1041_v44  ;;  %vm459_vm7 = vcmp.eq.s32.totalorder %v456_v29, 1  ;;  %p817_p13 = pnand %p816_p12, %p812_p9 }
  0xb3   : > { %v354_v49 = vmul.f32 %v760_v38, %v353_v45 }
  0xb4   : > { %v369_v52 = vmul.f32 %v762_v39, %v368_v47 }
  0xb5   : > { %v764_v54 = vpop.eup %763  ;;  %v355_v56 = vadd.f32 %v760_v38, %v354_v49 }
  0xb6   : > { %v382_v58 = vmul.f32 %v764_v54, %v1028_v37  ;;  %v370_v59 = vadd.f32 %v762_v39, %v369_v52  ;;  %vm387_vm15 = vweird.f32 %v764_v54  ;;  %v465_v8 = vpop.permute.xlu1 %464 }
  0xb7   : > { %v359_v61 = vsel %vm358_vm8, %v760_v38, %v355_v56  ;;  %v468_v15 = vpop.permute.xlu2 %467  ;;  %vm388_vm2 = vmor %vm386_vm1, %vm387_vm15  ;;  %vm472_vm6 = vcmp.eq.s32.totalorder %v465_v8, 1 }
  0xb8   : > { %v364_v63 = vsel %vm361_vm10, %v363_v57, %v359_v61  ;;  %v383_v0 = vsub.f32 1.0, %v382_v58  ;;  %v374_v1 = vsel %vm373_vm12, %v762_v39, %v370_v59  ;;  %vm473_vm5 = vcmp.eq.s32.totalorder %v468_v15, 1 }
  0xb9   : > { %v396_v2 = vmul.f32 2.0, %v364_v63  ;;  %v379_v4 = vsel %vm376_vm13, %v378_v62, %v374_v1 }
  0xba   : > { %v384_v5 = vmul.f32 %v764_v54, %v383_v0  ;;  %v397_v7 = vmul.f32 2.0, %v379_v4 }
  0xbb   : > { %v659_v10 = vadd.f32 -0.5, %v396_v2  ;;  %v430_v11 = vmul.f32 %v396_v2, %v396_v2 }
  0xbc   : > { %v385_v12 = vadd.f32 %v764_v54, %v384_v5  ;;  %v660_v13 = vadd.f32 -0.5, %v397_v7  ;;  %v431_v14 = vmul.f32 %v397_v7, %v397_v7 }
  0xbd   : > { %v424_v16 = vadd.f32 %v659_v10, %v418_v9  ;;  %v445_v18 = vmul.f32 %v435_v60, %v430_v11 }
  0xbe   : > { %v389_v19 = vsel %vm388_vm2, %v764_v54, %v385_v12  ;;  %v446_v20 = vmul.f32 %v1024_v33, %v431_v14  ;;  %v425_v21 = vadd.f32 %v660_v13, %v419_v55  ;;  %v471_v38 = vpop.permute.xlu1 %470 }
  0xbf   : > { %v427_v22 = vmul.f32 8.0, %v424_v16  ;;  %v394_v23 = vsel %vm391_vm4, %v393_v17, %v389_v19  ;;  %v460_v24 = vsel %vm457_vm3, %v445_v18, %v364_v63  ;;  %vm474_vm8 = vcmp.eq.s32.totalorder %v471_v38, 1 }
  0xc0   : > { %v398_v25 = vmul.f32 2.0, %v394_v23  ;;  %v461_v27 = vsel %vm458_vm0, %v446_v20, %v379_v4  ;;  %v428_v28 = vmul.f32 8.0, %v425_v21 }
  0xc1   : > { %v475_v30 = vsel %vm472_vm6, %v427_v22, %v460_v24 }
  0xc2   : > { %v661_v31 = vadd.f32 -0.5, %v398_v25  ;;  %v432_v32 = vmul.f32 %v398_v25, %v398_v25  ;;  %v476_v33 = vsel %vm473_vm5, %v428_v28, %v461_v27  ;;  %478 = vst [vmem:[%s263_s8] sm:$0xff] %v475_v30 }
  0xc3   : > { %479 = vst [vmem:[%s263_s8 + $0x8] sm:$0xff] %v476_v33 }
  0xc4   : > { %v426_v36 = vadd.f32 %v661_v31, %v420_v34  ;;  %v447_v37 = vmul.f32 %v1026_v35, %v432_v32 }
  0xc6   : > { %v429_v39 = vmul.f32 8.0, %v426_v36  ;;  %v462_v40 = vsel %vm459_vm7, %v447_v37, %v394_v23 }
  0xc8   : > { %v477_v41 = vsel %vm474_vm8, %v429_v39, %v462_v40 }
  0xc9   : > { %480 = vst [vmem:[%s263_s8 + $0x10] sm:$0xff] %v477_v41 }
  0xca   : > { %820 = shalt.err (!%p817_p13)
}
  0xcb   : > { %672 = dma.vmem_to_hbm [thread:$0]  (%p954_p4), %s519_s21, 384, %s521_s11, %s487_s10, %s882_s14, %s882_s14, %s883_s15  }
  0xcc PF: > { %p682_p0 = scmp.ge.s32.totalorder %s875_s23, 2  ;;  %s535_s9 = sand.u32 1, %s855_s18  }
  0xcd   : > { %s536_s29 = scalar_lea.sflag [#allocation3], %s535_s9 }
  0xce   : > { %p676_p1 = pnand %p682_p0, %p961_p8 }
  0xd0   : > { %p677_p2 = pneg %p676_p1 }
  0xd2   : > { %846 = dma.done.wait (%p677_p2), %s536_s29, 384  }
  0xd3   : > { %848 = vsyncadd (%p677_p2), %s536_s29, 4294966912  ;;  %s546_s7 = scalar_lea.sflag [#allocation5], %s535_s9 }
  0xd4   : > { %850 = dma.done.wait (%p677_p2), %s546_s7, 384  }
  0xd5   : > { %852 = vsyncadd (%p677_p2), %s546_s7, 4294966912  ;;  %s22_s23 = sadd.s32 1, %s875_s23   ;;  %s1116_s18 = smov %s859_s19 }
  0xd6   : > { %p19_p3 = scmp.ge.s32.totalorder %s22_s23, 4   ;;  %s1117_s19 = smov %s863_s20 }
  0xd7   : > { %s1118_s20 = smov %s967_s6  ;;  %s1119_s21 = smov %s871_s22 }
  0xd8   : > { %s1120_s22 = smov %s1122_s26  ;;  %21 = sbr.rel (!%p19_p3) target bundleno = 6 (0x6), region = 91 }
  0xdd   :  { %552 = vsyncpa [#allocation3], 1 }
  0xde   :  { %554 = vsyncpa [#allocation3 + $0x1], 1 }
  0xdf   :  { %555 = vsyncpa [#allocation5], 1 }
  0xe0   :  { %557 = vsyncpa [#allocation5 + $0x1], 1 }

</bundles_post_ra>
